<compile_context>
chip_gen: v7x
topology: tpu7x:2x2x1
jax: 0.10.0
libtpu: 0.0.40
codegen_flags: <defaults>
</compile_context>

<pallas_src>
import jax
import jax.numpy as jnp
from jax.experimental import pallas as pl
from jax.experimental.pallas import tpu as pltpu


def _round_up(n, m):
    return ((n + m - 1) // m) * m


def _cdiv(a, b):
    return -(-a // b)


def _spec(shape, index_map, buffers=None):
    """BlockSpec with optional explicit buffer count (fallback if unsupported)."""
    if buffers is None:
        return pl.BlockSpec(shape, index_map)
    try:
        return pl.BlockSpec(shape, index_map, pipeline_mode=pl.Buffered(buffers))
    except TypeError:  # older jax without pipeline_mode kwarg
        return pl.BlockSpec(shape, index_map)


def _vmem_budget():
    try:
        cap = int(pltpu.get_tpu_info().vmem_capacity_bytes)
    except Exception:
        cap = 64 << 20  # conservative (v7x per-TC)
    return cap, int(cap * 0.8)


def mlp_kernel(x_ref, w1_ref, w2_ref, o_ref, acc_ref):
    """One (token-tile, hidden-tile) step:
         acc += relu6(x @ W1[:, h0:h1]) @ W2[h0:h1, :]
       init at h==0, writeback at the last hidden tile."""
    h_idx = pl.program_id(1)

    @pl.when(h_idx == 0)
    def _():
        acc_ref[...] = jnp.zeros_like(acc_ref)

    # Cast x to the weight compute dtype (bf16) in-kernel: avoids an HBM
    # round-trip for a pre-cast copy of the activations.
    x = x_ref[...].astype(w1_ref.dtype)
    h = jnp.dot(x, w1_ref[...], preferred_element_type=jnp.float32)
    h = jnp.clip(h, 0.0, 6.0)  # ReLU6 on the f32 accumulator (VPU)
    # TODO(synk): nn.Dropout(p=0.5) is identity in eval mode; training-mode
    # stochastic dropout (pltpu.prng_random_bits masking) intentionally omitted.
    acc_ref[...] += jnp.dot(h.astype(w2_ref.dtype), w2_ref[...],
                            preferred_element_type=jnp.float32)

    @pl.when(h_idx == pl.num_programs(1) - 1)
    def _():
        o_ref[...] = acc_ref[...].astype(o_ref.dtype)


def prepare_mlp_params(w1_t, w2_t, *, compute_dtype=jnp.bfloat16):
    """One-time weight preparation (pad to lane-dense 128 multiples, cast to
    bf16, choose the hidden tile).  w1_t:(C_in,H), w2_t:(H,C_out) — i.e. the
    PyTorch Linear weights transposed."""
    c_in, hid = w1_t.shape
    hid2, c_out = w2_t.shape
    assert hid == hid2, "fc1 output dim must match fc2 input dim"

    c_in_p = _round_up(c_in, 128)
    hid_p = _round_up(hid, 128)
    c_out_p = _round_up(c_out, 128)

    cd = jnp.dtype(compute_dtype)
    vmem_cap, vmem_budget = _vmem_budget()

    # Choose the hidden tile so the (possibly double-buffered) weight tiles use
    # at most ~half the VMEM budget; prefer 256-wide chunks (full 256x256 MXU).
    n_h, th = 1, hid_p
    while True:
        w_bufs = 1 if n_h == 1 else 2
        w_bytes = w_bufs * (c_in_p + c_out_p) * th * cd.itemsize
        if w_bytes <= vmem_budget // 2 or th <= 256:
            break
        n_h *= 2
        chunk = _cdiv(hid_p, n_h)
        th = _round_up(chunk, 256 if chunk > 256 else 128)
    n_h = _cdiv(hid_p, th)
    hid_pad = n_h * th  # zero-padding the hidden dim is exact

    w1_pad = jnp.zeros((c_in_p, hid_pad), compute_dtype)
    w1_pad = w1_pad.at[:c_in, :hid].set(w1_t.astype(compute_dtype))
    w2_pad = jnp.zeros((hid_pad, c_out_p), compute_dtype)
    w2_pad = w2_pad.at[:hid, :c_out].set(w2_t.astype(compute_dtype))

    return dict(w1=w1_pad, w2=w2_pad,
                c_in=c_in, hid=hid, c_out=c_out,
                c_in_p=c_in_p, hid_pad=hid_pad, c_out_p=c_out_p,
                th=th, n_h=n_h, compute_dtype=cd,
                vmem_cap=vmem_cap, vmem_budget=vmem_budget)


def mlp_forward(x, params, *, tile_rows=512, out_dtype=None):
    """x: (..., C_in) -> (..., C_out) using prepared/padded weights."""
    c_in, c_out = params["c_in"], params["c_out"]
    c_in_p, c_out_p = params["c_in_p"], params["c_out_p"]
    hid_pad, th, n_h = params["hid_pad"], params["th"], params["n_h"]
    cd = params["compute_dtype"]
    vmem_cap, vmem_budget = params["vmem_cap"], params["vmem_budget"]

    orig_shape = x.shape
    assert orig_shape[-1] == c_in
    out_dtype = jnp.dtype(out_dtype) if out_dtype is not None else x.dtype
    x_item = jnp.dtype(x.dtype).itemsize
    out_item = jnp.dtype(out_dtype).itemsize

    x2d = x.reshape(-1, c_in)
    tokens = x2d.shape[0]

    # Token tile: big by default (512), 16-row multiple (bf16 sublane packing),
    # clamped for tiny inputs, shrunk only if VMEM requires it.
    tr = min(tile_rows, _round_up(tokens, 16))
    w_bufs = 1 if n_h == 1 else 2

    def block_bytes(tr_):
        return (2 * tr_ * c_in_p * x_item                       # x tile (x2)
                + w_bufs * (c_in_p * th + th * c_out_p) * cd.itemsize
                + 2 * tr_ * c_out_p * out_item                   # out tile (x2)
                + tr_ * c_out_p * 4                              # f32 accumulator
                + tr_ * th * 4)                                  # f32 fc1 tile

    while block_bytes(tr) > vmem_budget and tr > 128:
        tr = max(128, tr // 2)

    tokens_p = _round_up(tokens, tr)

    # Pad x ONLY when actually needed (common case: no copy at all).
    if tokens_p != tokens or c_in_p != c_in:
        x_in = jnp.pad(x2d, ((0, tokens_p - tokens), (0, c_in_p - c_in)))
    else:
        x_in = x2d

    n_tok_tiles = tokens_p // tr
    grid = (n_tok_tiles, n_h)

    # VMEM limit: never below requested usage, never above physical capacity
    # unless usage itself exceeds it (in which case let the compiler decide).
    bb = block_bytes(tr)
    vmem_limit = min(max(bb + (8 << 20), 32 << 20), vmem_cap)
    vmem_limit = max(vmem_limit, bb + (2 << 20))

    flops = 2 * tokens_p * c_in_p * hid_pad + 2 * tokens_p * hid_pad * c_out_p
    w_reads = 1 if n_h == 1 else n_tok_tiles
    bytes_accessed = (tokens_p * c_in_p * x_item
                      + w_reads * (c_in_p * hid_pad + hid_pad * c_out_p) * cd.itemsize
                      + tokens_p * c_out_p * out_item)

    weight_buffers = 1 if n_h == 1 else None  # single-buffer constant-index weights

    out = pl.pallas_call(
        mlp_kernel,
        out_shape=jax.ShapeDtypeStruct((tokens_p, c_out_p), out_dtype),
        grid_spec=pltpu.PrefetchScalarGridSpec(
            num_scalar_prefetch=0,
            grid=grid,
            in_specs=[
                # token tile of x; constant across the hidden axis (no re-DMA)
                _spec((tr, c_in_p), lambda i, h: (i, 0)),
                # hidden-tiled weights
                _spec((c_in_p, th), lambda i, h: (0, h), buffers=weight_buffers),
                _spec((th, c_out_p), lambda i, h: (h, 0), buffers=weight_buffers),
            ],
            out_specs=pl.BlockSpec((tr, c_out_p), lambda i, h: (i, 0)),
            scratch_shapes=[pltpu.VMEM((tr, c_out_p), jnp.float32)],
        ),
        compiler_params=pltpu.CompilerParams(
            dimension_semantics=("parallel", "arbitrary"),
            vmem_limit_bytes=int(vmem_limit),
        ),
        cost_estimate=pl.CostEstimate(
            flops=flops, transcendentals=0, bytes_accessed=bytes_accessed),
    )(x_in, params["w1"], params["w2"])

    out = out[:tokens, :c_out]
    return out.reshape(orig_shape[:-1] + (c_out,))


if __name__ == "__main__":
    # Module config (Mlp defaults: out = hidden = in unless given)
    in_features = 32
    hidden_features = 64
    out_features = 32
    batch, seq = 2, 8  # tokens = 16

    key = jax.random.PRNGKey(0)
    kx, k1, k2 = jax.random.split(key, 3)

    x = jax.random.normal(kx, (batch, seq, in_features), dtype=jnp.float32)

    # nn.Linear(in, hidden, bias=False) / nn.Linear(hidden, out, bias=False),
    # stored here already transposed to (in, out).
    w1_t = (jax.random.normal(k1, (in_features, hidden_features), dtype=jnp.float32)
            * (1.0 / jnp.sqrt(in_features)))
    w2_t = (jax.random.normal(k2, (hidden_features, out_features), dtype=jnp.float32)
            * (1.0 / jnp.sqrt(hidden_features)))

    # One-time weight preparation (pad + cast hoisted out of the forward path).
    params = prepare_mlp_params(w1_t, w2_t)

    y = mlp_forward(x, params)
    jax.block_until_ready(y)

    # Reference with matching bf16-operand / f32-accumulate numerics.
    xb = x.reshape(-1, in_features).astype(jnp.bfloat16)
    h_ref = jnp.clip(
        jnp.dot(xb, w1_t.astype(jnp.bfloat16),
                preferred_element_type=jnp.float32), 0.0, 6.0)
    ref = jnp.dot(h_ref.astype(jnp.bfloat16), w2_t.astype(jnp.bfloat16),
                  preferred_element_type=jnp.float32)
    ref = ref.reshape(batch, seq, out_features).astype(x.dtype)

    assert y.shape == (batch, seq, out_features)
    assert jnp.allclose(y, ref, atol=2e-2, rtol=2e-2)

    print("KERNEL_OK")
</pallas_src>

<mosaic_0001>
module attributes {stable_mosaic.version = 11 : i64} {
  func.func @mlp_kernel(%arg0: i32, %arg1: i32, %arg2: memref<16x128xf32, #tpu.memory_space<vmem>>, %arg3: memref<128x128xbf16, #tpu.memory_space<vmem>>, %arg4: memref<128x128xbf16, #tpu.memory_space<vmem>>, %arg5: memref<16x128xf32, #tpu.memory_space<vmem>>, %arg6: memref<16x128xf32, #tpu.memory_space<vmem>>) attributes {dimension_semantics = [#tpu.dimension_semantics<parallel>, #tpu.dimension_semantics<arbitrary>], iteration_bounds = array<i64: 1, 1>, scalar_prefetch = 0 : i64, scratch_operands = 1 : i64, tpu.core_type = #tpu.core_type<tc>, window_params = [{transform_indices = @transform_0, window_bounds = array<i64: 16, 128>}, {pipeline_mode = #tpu.pipeline_mode<synchronous>, transform_indices = @transform_1, window_bounds = array<i64: 128, 128>}, {pipeline_mode = #tpu.pipeline_mode<synchronous>, transform_indices = @transform_2, window_bounds = array<i64: 128, 128>}, {transform_indices = @transform_3, window_bounds = array<i64: 16, 128>}]} {
    %c0_i32 = arith.constant 0 : i32
    %0 = arith.cmpi eq, %arg1, %c0_i32 : i32
    %1 = arith.extui %0 : i1 to i32
    %c0_i32_0 = arith.constant 0 : i32
    %2 = arith.cmpi ne, %1, %c0_i32_0 : i32
    scf.if %2 {
      %cst_15 = arith.constant 0.000000e+00 : f32
      %20 = vector.broadcast %cst_15 : f32 to vector<16x128xf32>
      %c0_16 = arith.constant 0 : index
      %c0_17 = arith.constant 0 : index
      %21 = vector.load %arg6[%c0_16, %c0_17] : memref<16x128xf32, #tpu.memory_space<vmem>>, vector<16x128xf32>
      tpu.vector_store %arg6[%c0_16, %c0_17], %20 {strides = array<i32>} : memref<16x128xf32, #tpu.memory_space<vmem>>, vector<16x128xf32>,
    } else {
    }
    %c0 = arith.constant 0 : index
    %c0_1 = arith.constant 0 : index
    %3 = vector.load %arg2[%c0, %c0_1] : memref<16x128xf32, #tpu.memory_space<vmem>>, vector<16x128xf32>
    %4 = arith.truncf %3 : vector<16x128xf32> to vector<16x128xbf16>
    %c0_2 = arith.constant 0 : index
    %c0_3 = arith.constant 0 : index
    %5 = vector.load %arg3[%c0_2, %c0_3] : memref<128x128xbf16, #tpu.memory_space<vmem>>, vector<128x128xbf16>
    %cst = arith.constant dense<0.000000e+00> : vector<16x128xf32>
    %6 = tpu.matmul %4, %5, %cst {dimension_numbers = #tpu.dot_dimension_numbers<[1], [0], [0], [1], [0, 0, 1, 1], [], []>} : vector<16x128xbf16>, vector<128x128xbf16>, vector<16x128xf32> -> vector<16x128xf32>
    %cst_4 = arith.constant 0.000000e+00 : f32
    %cst_5 = arith.constant 6.000000e+00 : f32
    %7 = vector.broadcast %cst_4 : f32 to vector<16x128xf32>
    %8 = arith.maximumf %7, %6 : vector<16x128xf32>
    %9 = vector.broadcast %cst_5 : f32 to vector<16x128xf32>
    %10 = arith.minimumf %9, %8 : vector<16x128xf32>
    %c0_6 = arith.constant 0 : index
    %c0_7 = arith.constant 0 : index
    %11 = vector.load %arg6[%c0_6, %c0_7] : memref<16x128xf32, #tpu.memory_space<vmem>>, vector<16x128xf32>
    %12 = arith.truncf %10 : vector<16x128xf32> to vector<16x128xbf16>
    %c0_8 = arith.constant 0 : index
    %c0_9 = arith.constant 0 : index
    %13 = vector.load %arg4[%c0_8, %c0_9] : memref<128x128xbf16, #tpu.memory_space<vmem>>, vector<128x128xbf16>
    %cst_10 = arith.constant dense<0.000000e+00> : vector<16x128xf32>
    %14 = tpu.matmul %12, %13, %cst_10 {dimension_numbers = #tpu.dot_dimension_numbers<[1], [0], [0], [1], [0, 0, 1, 1], [], []>} : vector<16x128xbf16>, vector<128x128xbf16>, vector<16x128xf32> -> vector<16x128xf32>
    %15 = arith.addf %11, %14 : vector<16x128xf32>
    %c0_11 = arith.constant 0 : index
    %c0_12 = arith.constant 0 : index
    %16 = vector.load %arg6[%c0_11, %c0_12] : memref<16x128xf32, #tpu.memory_space<vmem>>, vector<16x128xf32>
    tpu.vector_store %arg6[%c0_11, %c0_12], %15 {strides = array<i32>} : memref<16x128xf32, #tpu.memory_space<vmem>>, vector<16x128xf32>,
    %c0_i32_13 = arith.constant 0 : i32
    %17 = arith.cmpi eq, %arg1, %c0_i32_13 : i32
    %18 = arith.extui %17 : i1 to i32
    %c0_i32_14 = arith.constant 0 : i32
    %19 = arith.cmpi ne, %18, %c0_i32_14 : i32
    scf.if %19 {
      %c0_15 = arith.constant 0 : index
      %c0_16 = arith.constant 0 : index
      %20 = vector.load %arg6[%c0_15, %c0_16] : memref<16x128xf32, #tpu.memory_space<vmem>>, vector<16x128xf32>
      %c0_17 = arith.constant 0 : index
      %c0_18 = arith.constant 0 : index
      %21 = vector.load %arg5[%c0_17, %c0_18] : memref<16x128xf32, #tpu.memory_space<vmem>>, vector<16x128xf32>
      tpu.vector_store %arg5[%c0_17, %c0_18], %20 {strides = array<i32>} : memref<16x128xf32, #tpu.memory_space<vmem>>, vector<16x128xf32>,
    } else {
    }
    return
  }
  func.func @transform_0(%arg0: i32, %arg1: i32) -> (i32, i32) {
    %c0_i32 = arith.constant 0 : i32
    %c0_i32_0 = arith.constant 0 : i32
    return %arg0, %c0_i32 : i32, i32
  }
  func.func @transform_1(%arg0: i32, %arg1: i32) -> (i32, i32) {
    %c0_i32 = arith.constant 0 : i32
    %c0_i32_0 = arith.constant 0 : i32
    return %c0_i32, %arg1 : i32, i32
  }
  func.func @transform_2(%arg0: i32, %arg1: i32) -> (i32, i32) {
    %c0_i32 = arith.constant 0 : i32
    %c0_i32_0 = arith.constant 0 : i32
    return %arg1, %c0_i32 : i32, i32
  }
  func.func @transform_3(%arg0: i32, %arg1: i32) -> (i32, i32) {
    %c0_i32 = arith.constant 0 : i32
    %c0_i32_0 = arith.constant 0 : i32
    return %arg0, %c0_i32 : i32, i32
  }
}

</mosaic_0001>

<bundles_post_ra>
// kernel: tpu_custom_call.1
= control target key start
LH: loop header
LB: loop body
LE: loop exit
PB: predicated region body
PF: predicated region fallthrough
CT: control target
= control target key end

     0   :  { %8 = vsyncpa [#allocation4], 0  ;;  %s596_s0 = inlined_call_operand.hbm [shape: f32[16,128], index: 0, kind: input, shape index: {}]   ;;  %s597_s1 = inlined_call_operand.hbm [shape: bf16[128,128], index: 1, kind: input, shape index: {}]   ;;  %s598_s2 = inlined_call_operand.hbm [shape: bf16[128,128], index: 2, kind: input, shape index: {}]   ;;  %s599_s3 = inlined_call_operand.hbm [shape: f32[16,128], index: 3, kind: output, shape index: {}]  }
   0x1   :  { %9 = vsyncpa [#allocation7], 0 }
   0x2   :  { %10 = vsyncpa [#allocation5], 0  ;;  %s506_s12 = smov [#allocation6]   ;;  %s412_s16 = scalar_lea.hbm %s597_s1, 1024 }
   0x3   :  { %s28_s13 = sshll.u32 %s506_s12, 4  ;;  %p413_p0 = scmp.ne.s32.totalorder %s597_s1, %s412_s16  ;;  %s29_s13 = int_to_ptr.vmem [resolvable:$true] %s28_s13 }
   0x4   :  { %p416_p1 = scmp.lt.u32.totalorder %s412_s16, %s597_s1 }
   0x6   :  { %p418_p2 = pnand %p416_p1, %p413_p0 }
   0x8   :  { %421 = shalt.err (!%p418_p2)
}
   0x9   :  { %s422_s21 = scalar_lea.vmem %s29_s13, 1024  ;;  %p427_p4 = scmp.lt.s32.totalorder %s29_s13, %s29_s13 }
   0xa   :  { %p423_p3 = scmp.ne.s32.totalorder %s29_s13, %s422_s21  ;;  %p428_p5 = scmp.lt.s32.totalorder %s422_s21, %s422_s21 }
   0xc   :  { %p429_p6 = por %p428_p5, %p427_p4 }
   0xe   :  { %p430_p7 = pnand %p429_p6, %p423_p3 }
  0x10   :  { %433 = shalt.err (!%p430_p7)
}
  0x11   :  { %s507_s22 = smov 64   ;;  %s508_s23 = smov 4  }
  0x12   :  { %34 = dma.hbm_to_vmem [thread:$0]  %s597_s1, 1024, %s29_s13, [#allocation7], %s507_s22, %s507_s22, %s508_s23  }
  0x13   :  { %s509_s26 = smov [#allocation3]   ;;  %s434_s30 = scalar_lea.hbm %s596_s0, 256 }
  0x14   :  { %s16_s27 = sshll.u32 %s509_s26, 4  ;;  %p435_p8 = scmp.ne.s32.totalorder %s596_s0, %s434_s30  ;;  %s17_s27 = int_to_ptr.vmem [resolvable:$true] %s16_s27 }
  0x15   :  { %p438_p9 = scmp.lt.u32.totalorder %s434_s30, %s596_s0 }
  0x17   :  { %p440_p10 = pnand %p438_p9, %p435_p8 }
  0x19   :  { %443 = shalt.err (!%p440_p10)
}
  0x1a   :  { %s444_s8 = scalar_lea.vmem %s17_s27, 256  ;;  %p449_p12 = scmp.lt.s32.totalorder %s17_s27, %s17_s27 }
  0x1b   :  { %p445_p11 = scmp.ne.s32.totalorder %s17_s27, %s444_s8  ;;  %p450_p13 = scmp.lt.s32.totalorder %s444_s8, %s444_s8 }
  0x1d   :  { %p451_p0 = por %p450_p13, %p449_p12 }
  0x1f   :  { %p452_p1 = pnand %p451_p0, %p445_p11 }
  0x21   :  { %455 = shalt.err (!%p452_p1)
}
  0x22   :  { %s510_s1 = smov 128   ;;  %s511_s9 = smov 8  }
  0x23   :  { %22 = dma.hbm_to_vmem [thread:$0]  %s596_s0, 256, %s17_s27, [#allocation4], %s510_s1, %s510_s1, %s511_s9  }
  0x24   :  { %s512_s12 = smov [#allocation8]   ;;  %s456_s16 = scalar_lea.hbm %s598_s2, 1024 }
  0x25   :  { %s40_s13 = sshll.u32 %s512_s12, 4  ;;  %p457_p2 = scmp.ne.s32.totalorder %s598_s2, %s456_s16  ;;  %s41_s13 = int_to_ptr.vmem [resolvable:$true] %s40_s13 }
  0x26   :  { %p460_p3 = scmp.lt.u32.totalorder %s456_s16, %s598_s2 }
  0x28   :  { %p462_p4 = pnand %p460_p3, %p457_p2 }
  0x2a   :  { %465 = shalt.err (!%p462_p4)
}
  0x2b   :  { %s466_s21 = scalar_lea.vmem %s41_s13, 1024  ;;  %p471_p6 = scmp.lt.s32.totalorder %s41_s13, %s41_s13 }
  0x2c   :  { %p467_p5 = scmp.ne.s32.totalorder %s41_s13, %s466_s21  ;;  %p472_p7 = scmp.lt.s32.totalorder %s466_s21, %s466_s21 }
  0x2e   :  { %p473_p8 = por %p472_p7, %p471_p6 }
  0x30   :  { %p474_p9 = pnand %p473_p8, %p467_p5 }
  0x32   :  { %477 = shalt.err (!%p474_p9)
}
  0x33   :  { %46 = dma.hbm_to_vmem [thread:$0]  %s598_s2, 1024, %s41_s13, [#allocation7], %s507_s22, %s507_s22, %s508_s23  }
  0x34   :  { %500 = dma.done.wait [#allocation4], 256  }
  0x35   :  { %501 = vsyncadd [#allocation4], 4294967040 }
  0x36   :  { %502 = dma.done.wait [#allocation7], 2048  }
  0x37   :  { %503 = vsyncadd [#allocation7], 4294965248  ;;  %v513_v0 = vmov 0.0   ;;  %vm514_vm0 = vmmov 0   ;;  %v396_v1 = vld [vmem:[#allocation6] sm:$0xff]   ;;  %v397_v2 = vld [vmem:[#allocation6 + $0x8] sm:$0xff]  }
  0x38   :  { %346 = vmatprep.subr.bf16.mxu0 %v513_v0  ;;  %362 = vmatprep.mubr.msk.bf16.mxu0 %vm514_vm0, %v513_v0  ;;  %v398_v3 = vld [vmem:[#allocation6 + $0x10] sm:$0xff]   ;;  %v404_v4 = vld [vmem:[#allocation8] sm:$0xff]   ;;  %v399_v5 = vld [vmem:[#allocation6 + $0x18] sm:$0xff]   ;;  %s515_s2 = smov [#allocation9]  }
  0x39   :  { %366 = vmatprep.subr.bf16.mxu1 %v513_v0  ;;  %382 = vmatprep.mubr.msk.bf16.mxu1 %vm514_vm0, %v513_v0  ;;  %v405_v6 = vld [vmem:[#allocation8 + $0x8] sm:$0xff]   ;;  %v400_v7 = vld [vmem:[#allocation6 + $0x20] sm:$0xff]   ;;  %v406_v8 = vld [vmem:[#allocation8 + $0x10] sm:$0xff]   ;;  %s299_s22 = sshll.u32 %s515_s2, 4  ;;  %s300_s22 = int_to_ptr.vmem [resolvable:$true] %s299_s22 }
  0x3a   :  { %347 = vmatpush3.bf16.msra.mxu0 %v396_v1  ;;  %367 = vmatpush3.bf16.msra.mxu1 %v404_v4  ;;  %v401_v9 = vld [vmem:[#allocation6 + $0x28] sm:$0xff]   ;;  %v407_v10 = vld [vmem:[#allocation8 + $0x18] sm:$0xff]   ;;  %v402_v11 = vld [vmem:[#allocation6 + $0x30] sm:$0xff]   ;;  %s478_s23 = scalar_lea.vmem %s300_s22, 256  ;;  %p483_p11 = scmp.lt.s32.totalorder %s300_s22, %s300_s22 }
  0x3b   :  { %348 = vmatprep.subr.bf16.mxu0 %v513_v0  ;;  %368 = vmatprep.subr.bf16.mxu1 %v513_v0  ;;  %v408_v12 = vld [vmem:[#allocation8 + $0x20] sm:$0xff]   ;;  %v403_v13 = vld [vmem:[#allocation6 + $0x38] sm:$0xff]   ;;  %v63_v14 = vld [vmem:[#allocation3] sm:$0xff]  ;;  %p479_p10 = scmp.ne.s32.totalorder %s300_s22, %s478_s23  ;;  %p484_p12 = scmp.lt.s32.totalorder %s478_s23, %s478_s23 }
  0x3c   :  { %v64_v15 = vld [vmem:[#allocation3 + $0x8] sm:$0xff]  ;;  %v409_v16 = vld [vmem:[#allocation8 + $0x28] sm:$0xff]   ;;  %v410_v18 = vld [vmem:[#allocation8 + $0x30] sm:$0xff]  }
  0x3d   :  { %v65_v17 = vpack.c.bf16 %v64_v15, %v63_v14  ;;  %v411_v19 = vld [vmem:[#allocation8 + $0x38] sm:$0xff]   ;;  %p485_p13 = por %p484_p12, %p483_p11 }
  0x3e   :  { %349 = vmatpush3.bf16.msra.mxu0 %v397_v2  ;;  %369 = vmatpush3.bf16.msra.mxu1 %v405_v6 }
  0x3f   :  { %350 = vmatprep.subr.bf16.mxu0 %v513_v0  ;;  %370 = vmatprep.subr.bf16.mxu1 %v513_v0  ;;  %p486_p0 = pnand %p485_p13, %p479_p10 }
  0x42   :  { %351 = vmatpush3.bf16.msra.mxu0 %v398_v3  ;;  %371 = vmatpush3.bf16.msra.mxu1 %v406_v8 }
  0x43   :  { %352 = vmatprep.subr.bf16.mxu0 %v513_v0  ;;  %372 = vmatprep.subr.bf16.mxu1 %v513_v0 }
  0x46   :  { %353 = vmatpush3.bf16.msra.mxu0 %v399_v5  ;;  %373 = vmatpush3.bf16.msra.mxu1 %v407_v10 }
  0x47   :  { %354 = vmatprep.subr.bf16.mxu0 %v513_v0  ;;  %374 = vmatprep.subr.bf16.mxu1 %v513_v0 }
  0x4a   :  { %355 = vmatpush3.bf16.msra.mxu0 %v400_v7  ;;  %375 = vmatpush3.bf16.msra.mxu1 %v408_v12 }
  0x4b   :  { %356 = vmatprep.subr.bf16.mxu0 %v513_v0  ;;  %376 = vmatprep.subr.bf16.mxu1 %v513_v0 }
  0x4e   :  { %357 = vmatpush3.bf16.msra.mxu0 %v401_v9  ;;  %377 = vmatpush3.bf16.msra.mxu1 %v409_v16 }
  0x4f   :  { %358 = vmatprep.subr.bf16.mxu0 %v513_v0  ;;  %378 = vmatprep.subr.bf16.mxu1 %v513_v0 }
  0x52   :  { %359 = vmatpush3.bf16.msra.mxu0 %v402_v11  ;;  %379 = vmatpush3.bf16.msra.mxu1 %v410_v18 }
  0x53   :  { %360 = vmatprep.subr.bf16.mxu0 %v513_v0  ;;  %380 = vmatprep.subr.bf16.mxu1 %v513_v0 }
  0x56   :  { %361 = vmatpush3.bf16.msra.mxu0 %v403_v13  ;;  %381 = vmatpush3.bf16.msra.mxu1 %v411_v19 }
  0x59   :  { %363 = vmatmul.mubr.bf16.vlgmr.msra.gmra.mrb[0].mxu0 %v65_v17 }
 0x12c   :  { %v164_v20 = vpop.f32.mrb[0].mxu0 }
 0x12d   :  { %v171_v21 = vmax.f32 %v164_v20, 0.0  ;;  %v364_v22 = vpop.f32.mrb[1].mxu0 }
 0x12e   :  { %v167_v23 = vpop.f32.mrb[2].mxu0 }
 0x12f   :  { %v172_v24 = vmax.f32 %v167_v23, 0.0  ;;  %v365_v25 = vpop.f32.mrb[3].mxu0  ;;  %v173_v26 = vmin.f32 %v171_v21, 6.0 }
 0x131   :  { %v174_v27 = vmin.f32 %v172_v24, 6.0 }
 0x133   :  { %v177_v28 = vpack.c.bf16 %v174_v27, %v173_v26 }
 0x135   :  { %383 = vmatmul.mubr.bf16.vlgmr.msra.gmra.mrb[0].mxu1 %v177_v28 }
 0x208   :  { %v276_v29 = vpop.f32.mrb[0].mxu1 }
 0x209   :  { %292 = vst [vmem:[#allocation9] sm:$0xff] %v276_v29  ;;  %v384_v30 = vpop.f32.mrb[1].mxu1 }
 0x20a   :  { %v279_v31 = vpop.f32.mrb[2].mxu1 }
 0x20b   :  { %293 = vst [vmem:[#allocation9 + $0x8] sm:$0xff] %v279_v31  ;;  %v385_v32 = vpop.f32.mrb[3].mxu1 }
 0x20c   :  { %489 = shalt.err (!%p486_p0)
}
 0x20d   :  { %s490_s27 = scalar_lea.hbm %s599_s3, 256 }
 0x20e   :  { %p491_p1 = scmp.ne.s32.totalorder %s599_s3, %s490_s27  ;;  %p494_p2 = scmp.lt.u32.totalorder %s490_s27, %s599_s3 }
 0x210   :  { %p496_p3 = pnand %p494_p2, %p491_p1 }
 0x212   :  { %499 = shalt.err (!%p496_p3)
}
 0x213   :  { %305 = dma.vmem_to_hbm [thread:$0]  %s300_s22, 256, %s599_s3, [#allocation5], %s510_s1, %s510_s1, %s511_s9  }
 0x214   :  { %504 = dma.done.wait [#allocation5], 256  }
 0x215   :  { %505 = vsyncadd [#allocation5], 4294967040 }
 0x216   :  { %309 = vsyncpa [#allocation4], 1 }
 0x217   :  { %310 = vsyncpa [#allocation7], 1 }
 0x218   :  { %311 = vsyncpa [#allocation5], 1 }

</bundles_post_ra>
